<compile_context>
chip_gen: v7x
topology: tpu7x:2x2x1
jax: 0.10.0
libtpu: 0.0.40
codegen_flags: <defaults>
</compile_context>

<pallas_src>
import functools

import jax
import jax.numpy as jnp
from jax.experimental import pallas as pl
from jax.experimental.pallas import tpu as pltpu

_VMEM_LIMIT = 64 * 1024 * 1024  # explicit scoped-VMEM budget (v5e default is 16 MiB)


# ---------------------------------------------------------------------------
# Stage 1: fused Q/K/V projections (token tiles x full model_dim)
# ---------------------------------------------------------------------------
def _qkv_proj_kernel(xq_ref, xk_ref, xv_ref,
                     wq_ref, bq_ref, wk_ref, bk_ref, wv_ref, bv_ref,
                     q_ref, k_ref, v_ref):
    q_ref[...] = (jnp.dot(xq_ref[...], wq_ref[...],
                          preferred_element_type=jnp.float32)
                  + bq_ref[...]).astype(q_ref.dtype)
    k_ref[...] = (jnp.dot(xk_ref[...], wk_ref[...],
                          preferred_element_type=jnp.float32)
                  + bk_ref[...]).astype(k_ref.dtype)
    v_ref[...] = (jnp.dot(xv_ref[...], wv_ref[...],
                          preferred_element_type=jnp.float32)
                  + bv_ref[...]).astype(v_ref.dtype)


# ---------------------------------------------------------------------------
# Stage 2: scaled dot-product attention, (group block) x (query tile) grid
# ---------------------------------------------------------------------------
def _attention_kernel(q_ref, k_ref, v_ref, ctx_ref, *att_refs, scale):
    # q_ref: (gb, tq, dph); k_ref/v_ref: (gb, S, dph).  Native dtype straight
    # into the MXU; fp32 accumulation via preferred_element_type.
    q = q_ref[...] * scale                                   # fold scale into q
    s = jnp.einsum("gqd,gkd->gqk", q, k_ref[...],
                   preferred_element_type=jnp.float32)       # (gb, tq, S) fp32
    # TODO(synk): attn_mask / relative_q / relative_v branches not implemented;
    # the module defaults them all to None.
    m = jnp.max(s, axis=-1, keepdims=True)
    s = jnp.exp(s - m)                                       # reuse s in place
    l = jnp.sum(s, axis=-1, keepdims=True)
    p = s * pl.reciprocal(l, approx=True)                    # EUP, no division

    if att_refs:                                             # optional writeback
        att_refs[0][...] = p.astype(att_refs[0].dtype)

    ctx_ref[...] = jnp.einsum("gqk,gkd->gqd",
                              p.astype(v_ref.dtype), v_ref[...],
                              preferred_element_type=jnp.float32
                              ).astype(ctx_ref.dtype)


# ---------------------------------------------------------------------------
# Stage 3: final linear + residual + LayerNorm (token tiles x full model_dim)
# ---------------------------------------------------------------------------
def _output_kernel(ctx_ref, res_ref, wo_ref, bo_ref, gamma_ref, beta_ref,
                   o_ref, *, eps):
    y = jnp.dot(ctx_ref[...], wo_ref[...],
                preferred_element_type=jnp.float32) + bo_ref[...]
    z = y + res_ref[...].astype(jnp.float32)
    mu = jnp.mean(z, axis=-1, keepdims=True)
    var = jnp.mean((z - mu) * (z - mu), axis=-1, keepdims=True)
    zn = (z - mu) * jax.lax.rsqrt(var + eps)
    o_ref[...] = (zn * gamma_ref[...] + beta_ref[...]).astype(o_ref.dtype)


# ---------------------------------------------------------------------------
# Wrapper
# ---------------------------------------------------------------------------
def multi_head_attention(query, key, value,
                         wq, bq, wk, bk, wv, bv, wo, bo, gamma, beta,
                         *, num_heads, tile_m=512, group_block=4, tile_q=256,
                         eps=1e-5, return_attention=True, attention_dtype=None):
    """query/key/value: [B, S, D]; linear weights pre-transposed as [in, out]."""
    B, S, D = query.shape
    H = num_heads
    assert D % H == 0, "model_dim must be divisible by num_heads"
    dph = D // H
    M = B * S
    G = B * H
    dtype = query.dtype
    att_dtype = attention_dtype or dtype

    # 2-D bias / affine params for lane-dense broadcasting inside kernels.
    bq, bk, bv, bo = (b.reshape(1, D) for b in (bq, bk, bv, bo))
    gamma, beta = gamma.reshape(1, D), beta.reshape(1, D)

    # Matches the module exactly: scale = (dim_per_head // num_heads) ** -0.5
    scale = float(dph // H) ** -0.5

    # ---- Stage 1: fused QKV projections over token tiles -------------------
    xq = query.reshape(M, D)
    xk = key.reshape(M, D)
    xv = value.reshape(M, D)

    tm = min(tile_m, M)
    grid_m = (pl.cdiv(M, tm),)
    tile_spec = pl.BlockSpec((tm, D), lambda i: (i, 0))
    w_spec = pl.BlockSpec((D, D), lambda i: (0, 0))
    b_spec = pl.BlockSpec((1, D), lambda i: (0, 0))

    q2d, k2d, v2d = pl.pallas_call(
        _qkv_proj_kernel,
        out_shape=(jax.ShapeDtypeStruct((M, D), dtype),
                   jax.ShapeDtypeStruct((M, D), dtype),
                   jax.ShapeDtypeStruct((M, D), dtype)),
        grid_spec=pltpu.PrefetchScalarGridSpec(
            num_scalar_prefetch=0,
            grid=grid_m,
            in_specs=[tile_spec, tile_spec, tile_spec,
                      w_spec, b_spec, w_spec, b_spec, w_spec, b_spec],
            out_specs=[tile_spec, tile_spec, tile_spec],
        ),
        compiler_params=pltpu.CompilerParams(
            dimension_semantics=("parallel",),
            vmem_limit_bytes=_VMEM_LIMIT),
    )(xq, xk, xv, wq, bq, wk, bk, wv, bv)

    # torch's .view(B*H, -1, dph) is a raw row-major reshape -> replicate it.
    qg = q2d.reshape(G, S, dph)
    kg = k2d.reshape(G, S, dph)
    vg = v2d.reshape(G, S, dph)

    # ---- Stage 2: attention over (group block) x (query tile) grid ---------
    gb = min(group_block, G)
    tq = min(tile_q, S)

    q_spec = pl.BlockSpec((gb, tq, dph), lambda g, qi: (g, qi, 0))
    kv_spec = pl.BlockSpec((gb, S, dph), lambda g, qi: (g, 0, 0))
    ctx_spec = pl.BlockSpec((gb, tq, dph), lambda g, qi: (g, qi, 0))

    out_shapes = [jax.ShapeDtypeStruct((G, S, dph), dtype)]
    out_specs = [ctx_spec]
    if return_attention:
        out_shapes.append(jax.ShapeDtypeStruct((G, S, S), att_dtype))
        out_specs.append(pl.BlockSpec((gb, tq, S), lambda g, qi: (g, qi, 0)))

    results = pl.pallas_call(
        functools.partial(_attention_kernel, scale=scale),
        out_shape=tuple(out_shapes),
        grid_spec=pltpu.PrefetchScalarGridSpec(
            num_scalar_prefetch=0,
            grid=(pl.cdiv(G, gb), pl.cdiv(S, tq)),
            in_specs=[q_spec, kv_spec, kv_spec],
            out_specs=out_specs,
        ),
        compiler_params=pltpu.CompilerParams(
            dimension_semantics=("parallel", "parallel"),
            vmem_limit_bytes=_VMEM_LIMIT),
    )(qg, kg, vg)

    if return_attention:
        ctxg, attention = results
    else:
        ctxg, attention = results[0], None

    # torch .view(B, -1, dph*H) is again a raw row-major reshape.
    ctx2d = ctxg.reshape(M, D)

    # ---- Stage 3: output projection + residual + LayerNorm -----------------
    res2d = query.reshape(M, D)

    out2d = pl.pallas_call(
        functools.partial(_output_kernel, eps=eps),
        out_shape=jax.ShapeDtypeStruct((M, D), dtype),
        grid_spec=pltpu.PrefetchScalarGridSpec(
            num_scalar_prefetch=0,
            grid=grid_m,
            in_specs=[tile_spec, tile_spec, w_spec, b_spec, b_spec, b_spec],
            out_specs=tile_spec,
        ),
        compiler_params=pltpu.CompilerParams(
            dimension_semantics=("parallel",),
            vmem_limit_bytes=_VMEM_LIMIT),
    )(ctx2d, res2d, wo, bo, gamma, beta)

    output = out2d.reshape(B, S, D)
    return output, attention


# ---------------------------------------------------------------------------
# Pure-JAX reference (mirrors the PyTorch forward, including the raw reshapes
# and the (dph // H) scale).
# ---------------------------------------------------------------------------
def _reference(query, key, value, wq, bq, wk, bk, wv, bv, wo, bo, gamma, beta,
               *, num_heads, eps=1e-5):
    B, S, D = query.shape
    H = num_heads
    dph = D // H
    q = jnp.einsum("bsd,de->bse", query, wq) + bq
    k = jnp.einsum("bsd,de->bse", key, wk) + bk
    v = jnp.einsum("bsd,de->bse", value, wv) + bv
    q = q.reshape(B * H, S, dph)
    k = k.reshape(B * H, S, dph)
    v = v.reshape(B * H, S, dph)
    scale = float(dph // H) ** -0.5
    att = jnp.einsum("gqd,gkd->gqk", q, k) * scale
    att = jax.nn.softmax(att, axis=-1)
    ctx = jnp.einsum("gqk,gkd->gqd", att, v)
    ctx = ctx.reshape(B, S, D)
    out = jnp.einsum("bsd,de->bse", ctx, wo) + bo
    z = out + query
    mu = jnp.mean(z, axis=-1, keepdims=True)
    var = jnp.mean((z - mu) ** 2, axis=-1, keepdims=True)
    out = (z - mu) * jax.lax.rsqrt(var + eps) * gamma + beta
    return out, att


if __name__ == "__main__":
    B, S = 2, 8
    model_dim, num_heads = 32, 4        # dph=8, scale=(8//4)**-0.5 like the module

    key0 = jax.random.PRNGKey(0)
    keys = jax.random.split(key0, 11)

    q_in = jax.random.normal(keys[0], (B, S, model_dim), dtype=jnp.float32)
    k_in = jax.random.normal(keys[1], (B, S, model_dim), dtype=jnp.float32)
    v_in = jax.random.normal(keys[2], (B, S, model_dim), dtype=jnp.float32)

    def mkw(k):
        return jax.random.normal(k, (model_dim, model_dim), dtype=jnp.float32) * 0.05

    def mkb(k):
        return jax.random.normal(k, (1, model_dim), dtype=jnp.float32) * 0.05

    wq, wk, wv, wo = mkw(keys[3]), mkw(keys[4]), mkw(keys[5]), mkw(keys[6])
    bq, bk, bv, bo = mkb(keys[7]), mkb(keys[8]), mkb(keys[9]), mkb(keys[10])
    gamma = jnp.ones((1, model_dim), dtype=jnp.float32)
    beta = jnp.zeros((1, model_dim), dtype=jnp.float32)

    out, att = multi_head_attention(q_in, k_in, v_in,
                                    wq, bq, wk, bk, wv, bv, wo, bo, gamma, beta,
                                    num_heads=num_heads)
    out = jax.block_until_ready(out)
    att = jax.block_until_ready(att)

    # Also exercise the no-attention-writeback fast path.
    out_noatt, _ = multi_head_attention(q_in, k_in, v_in,
                                        wq, bq, wk, bk, wv, bv, wo, bo,
                                        gamma, beta, num_heads=num_heads,
                                        return_attention=False)
    out_noatt = jax.block_until_ready(out_noatt)

    ref_out, ref_att = _reference(q_in, k_in, v_in,
                                  wq, bq, wk, bk, wv, bv, wo, bo, gamma, beta,
                                  num_heads=num_heads)

    assert out.shape == (B, S, model_dim)
    assert att.shape == (B * num_heads, S, S)
    # Tolerance slightly looser than fp32 epsilon because the softmax uses the
    # EUP approximate reciprocal (pl.reciprocal(approx=True)).
    assert jnp.allclose(out, ref_out, atol=2e-3, rtol=2e-3), "output mismatch vs reference"
    assert jnp.allclose(att, ref_att, atol=2e-3, rtol=2e-3), "attention mismatch vs reference"
    assert jnp.allclose(out_noatt, ref_out, atol=2e-3, rtol=2e-3), "no-att output mismatch"

    print("KERNEL_OK")
</pallas_src>

<mosaic_0001>
module attributes {stable_mosaic.version = 11 : i64} {
  func.func @_qkv_proj_kernel(%arg0: i32, %arg1: memref<16x32xf32, #tpu.memory_space<vmem>>, %arg2: memref<16x32xf32, #tpu.memory_space<vmem>>, %arg3: memref<16x32xf32, #tpu.memory_space<vmem>>, %arg4: memref<32x32xf32, #tpu.memory_space<vmem>>, %arg5: memref<1x32xf32, #tpu.memory_space<vmem>>, %arg6: memref<32x32xf32, #tpu.memory_space<vmem>>, %arg7: memref<1x32xf32, #tpu.memory_space<vmem>>, %arg8: memref<32x32xf32, #tpu.memory_space<vmem>>, %arg9: memref<1x32xf32, #tpu.memory_space<vmem>>, %arg10: memref<16x32xf32, #tpu.memory_space<vmem>>, %arg11: memref<16x32xf32, #tpu.memory_space<vmem>>, %arg12: memref<16x32xf32, #tpu.memory_space<vmem>>) attributes {dimension_semantics = [#tpu.dimension_semantics<parallel>], iteration_bounds = array<i64: 1>, scalar_prefetch = 0 : i64, scratch_operands = 0 : i64, tpu.core_type = #tpu.core_type<tc>, window_params = [{transform_indices = @transform_0, window_bounds = array<i64: 16, 32>}, {transform_indices = @transform_1, window_bounds = array<i64: 16, 32>}, {transform_indices = @transform_2, window_bounds = array<i64: 16, 32>}, {pipeline_mode = #tpu.pipeline_mode<synchronous>, transform_indices = @transform_3, window_bounds = array<i64: 32, 32>}, {pipeline_mode = #tpu.pipeline_mode<synchronous>, transform_indices = @transform_4, window_bounds = array<i64: 1, 32>}, {pipeline_mode = #tpu.pipeline_mode<synchronous>, transform_indices = @transform_5, window_bounds = array<i64: 32, 32>}, {pipeline_mode = #tpu.pipeline_mode<synchronous>, transform_indices = @transform_6, window_bounds = array<i64: 1, 32>}, {pipeline_mode = #tpu.pipeline_mode<synchronous>, transform_indices = @transform_7, window_bounds = array<i64: 32, 32>}, {pipeline_mode = #tpu.pipeline_mode<synchronous>, transform_indices = @transform_8, window_bounds = array<i64: 1, 32>}, {transform_indices = @transform_9, window_bounds = array<i64: 16, 32>}, {transform_indices = @transform_10, window_bounds = array<i64: 16, 32>}, {transform_indices = @transform_11, window_bounds = array<i64: 16, 32>}]} {
    %c0 = arith.constant 0 : index
    %c0_0 = arith.constant 0 : index
    %0 = vector.load %arg1[%c0, %c0_0] : memref<16x32xf32, #tpu.memory_space<vmem>>, vector<16x32xf32>
    %c0_1 = arith.constant 0 : index
    %c0_2 = arith.constant 0 : index
    %1 = vector.load %arg4[%c0_1, %c0_2] : memref<32x32xf32, #tpu.memory_space<vmem>>, vector<32x32xf32>
    %cst = arith.constant dense<0.000000e+00> : vector<16x32xf32>
    %2 = tpu.matmul %0, %1, %cst {dimension_numbers = #tpu.dot_dimension_numbers<[1], [0], [0], [1], [0, 0, 1, 1], [], []>} : vector<16x32xf32>, vector<32x32xf32>, vector<16x32xf32> -> vector<16x32xf32>
    %c0_3 = arith.constant 0 : index
    %c0_4 = arith.constant 0 : index
    %3 = vector.load %arg5[%c0_3, %c0_4] : memref<1x32xf32, #tpu.memory_space<vmem>>, vector<1x32xf32>
    %4 = vector.broadcast %3 : vector<1x32xf32> to vector<16x32xf32>
    %5 = arith.addf %2, %4 : vector<16x32xf32>
    %c0_5 = arith.constant 0 : index
    %c0_6 = arith.constant 0 : index
    %6 = vector.load %arg10[%c0_5, %c0_6] : memref<16x32xf32, #tpu.memory_space<vmem>>, vector<16x32xf32>
    tpu.vector_store %arg10[%c0_5, %c0_6], %5 {strides = array<i32>} : memref<16x32xf32, #tpu.memory_space<vmem>>, vector<16x32xf32>,
    %c0_7 = arith.constant 0 : index
    %c0_8 = arith.constant 0 : index
    %7 = vector.load %arg2[%c0_7, %c0_8] : memref<16x32xf32, #tpu.memory_space<vmem>>, vector<16x32xf32>
    %c0_9 = arith.constant 0 : index
    %c0_10 = arith.constant 0 : index
    %8 = vector.load %arg6[%c0_9, %c0_10] : memref<32x32xf32, #tpu.memory_space<vmem>>, vector<32x32xf32>
    %cst_11 = arith.constant dense<0.000000e+00> : vector<16x32xf32>
    %9 = tpu.matmul %7, %8, %cst_11 {dimension_numbers = #tpu.dot_dimension_numbers<[1], [0], [0], [1], [0, 0, 1, 1], [], []>} : vector<16x32xf32>, vector<32x32xf32>, vector<16x32xf32> -> vector<16x32xf32>
    %c0_12 = arith.constant 0 : index
    %c0_13 = arith.constant 0 : index
    %10 = vector.load %arg7[%c0_12, %c0_13] : memref<1x32xf32, #tpu.memory_space<vmem>>, vector<1x32xf32>
    %11 = vector.broadcast %10 : vector<1x32xf32> to vector<16x32xf32>
    %12 = arith.addf %9, %11 : vector<16x32xf32>
    %c0_14 = arith.constant 0 : index
    %c0_15 = arith.constant 0 : index
    %13 = vector.load %arg11[%c0_14, %c0_15] : memref<16x32xf32, #tpu.memory_space<vmem>>, vector<16x32xf32>
    tpu.vector_store %arg11[%c0_14, %c0_15], %12 {strides = array<i32>} : memref<16x32xf32, #tpu.memory_space<vmem>>, vector<16x32xf32>,
    %c0_16 = arith.constant 0 : index
    %c0_17 = arith.constant 0 : index
    %14 = vector.load %arg3[%c0_16, %c0_17] : memref<16x32xf32, #tpu.memory_space<vmem>>, vector<16x32xf32>
    %c0_18 = arith.constant 0 : index
    %c0_19 = arith.constant 0 : index
    %15 = vector.load %arg8[%c0_18, %c0_19] : memref<32x32xf32, #tpu.memory_space<vmem>>, vector<32x32xf32>
    %cst_20 = arith.constant dense<0.000000e+00> : vector<16x32xf32>
    %16 = tpu.matmul %14, %15, %cst_20 {dimension_numbers = #tpu.dot_dimension_numbers<[1], [0], [0], [1], [0, 0, 1, 1], [], []>} : vector<16x32xf32>, vector<32x32xf32>, vector<16x32xf32> -> vector<16x32xf32>
    %c0_21 = arith.constant 0 : index
    %c0_22 = arith.constant 0 : index
    %17 = vector.load %arg9[%c0_21, %c0_22] : memref<1x32xf32, #tpu.memory_space<vmem>>, vector<1x32xf32>
    %18 = vector.broadcast %17 : vector<1x32xf32> to vector<16x32xf32>
    %19 = arith.addf %16, %18 : vector<16x32xf32>
    %c0_23 = arith.constant 0 : index
    %c0_24 = arith.constant 0 : index
    %20 = vector.load %arg12[%c0_23, %c0_24] : memref<16x32xf32, #tpu.memory_space<vmem>>, vector<16x32xf32>
    tpu.vector_store %arg12[%c0_23, %c0_24], %19 {strides = array<i32>} : memref<16x32xf32, #tpu.memory_space<vmem>>, vector<16x32xf32>,
    return
  }
  func.func @transform_0(%arg0: i32) -> (i32, i32) {
    %c0_i32 = arith.constant 0 : i32
    %c0_i32_0 = arith.constant 0 : i32
    return %arg0, %c0_i32 : i32, i32
  }
  func.func @transform_1(%arg0: i32) -> (i32, i32) {
    %c0_i32 = arith.constant 0 : i32
    %c0_i32_0 = arith.constant 0 : i32
    return %arg0, %c0_i32 : i32, i32
  }
  func.func @transform_2(%arg0: i32) -> (i32, i32) {
    %c0_i32 = arith.constant 0 : i32
    %c0_i32_0 = arith.constant 0 : i32
    return %arg0, %c0_i32 : i32, i32
  }
  func.func @transform_3(%arg0: i32) -> (i32, i32) {
    %c0_i32 = arith.constant 0 : i32
    %c0_i32_0 = arith.constant 0 : i32
    %c0_i32_1 = arith.constant 0 : i32
    return %c0_i32, %c0_i32_0 : i32, i32
  }
  func.func @transform_4(%arg0: i32) -> (i32, i32) {
    %c0_i32 = arith.constant 0 : i32
    %c0_i32_0 = arith.constant 0 : i32
    %c0_i32_1 = arith.constant 0 : i32
    return %c0_i32, %c0_i32_0 : i32, i32
  }
  func.func @transform_5(%arg0: i32) -> (i32, i32) {
    %c0_i32 = arith.constant 0 : i32
    %c0_i32_0 = arith.constant 0 : i32
    %c0_i32_1 = arith.constant 0 : i32
    return %c0_i32, %c0_i32_0 : i32, i32
  }
  func.func @transform_6(%arg0: i32) -> (i32, i32) {
    %c0_i32 = arith.constant 0 : i32
    %c0_i32_0 = arith.constant 0 : i32
    %c0_i32_1 = arith.constant 0 : i32
    return %c0_i32, %c0_i32_0 : i32, i32
  }
  func.func @transform_7(%arg0: i32) -> (i32, i32) {
    %c0_i32 = arith.constant 0 : i32
    %c0_i32_0 = arith.constant 0 : i32
    %c0_i32_1 = arith.constant 0 : i32
    return %c0_i32, %c0_i32_0 : i32, i32
  }
  func.func @transform_8(%arg0: i32) -> (i32, i32) {
    %c0_i32 = arith.constant 0 : i32
    %c0_i32_0 = arith.constant 0 : i32
    %c0_i32_1 = arith.constant 0 : i32
    return %c0_i32, %c0_i32_0 : i32, i32
  }
  func.func @transform_9(%arg0: i32) -> (i32, i32) {
    %c0_i32 = arith.constant 0 : i32
    %c0_i32_0 = arith.constant 0 : i32
    return %arg0, %c0_i32 : i32, i32
  }
  func.func @transform_10(%arg0: i32) -> (i32, i32) {
    %c0_i32 = arith.constant 0 : i32
    %c0_i32_0 = arith.constant 0 : i32
    return %arg0, %c0_i32 : i32, i32
  }
  func.func @transform_11(%arg0: i32) -> (i32, i32) {
    %c0_i32 = arith.constant 0 : i32
    %c0_i32_0 = arith.constant 0 : i32
    return %arg0, %c0_i32 : i32, i32
  }
}

</mosaic_0001>

<bundles_post_ra>
// kernel: tpu_custom_call.1
= control target key start
LH: loop header
LB: loop body
LE: loop exit
PB: predicated region body
PF: predicated region fallthrough
CT: control target
= control target key end

     0   :  { %17 = vsyncpa [#allocation3], 0  ;;  %s1155_s0 = inlined_call_operand.hbm [shape: f32[16,32], index: 0, kind: input, shape index: {}]   ;;  %s1156_s1 = inlined_call_operand.hbm [shape: f32[16,32], index: 1, kind: input, shape index: {}]   ;;  %s1157_s2 = inlined_call_operand.hbm [shape: f32[16,32], index: 2, kind: input, shape index: {}]   ;;  %s1158_s3 = inlined_call_operand.hbm [shape: f32[32,32], index: 3, kind: input, shape index: {}]   ;;  %s1159_s4 = inlined_call_operand.hbm [shape: f32[1,32], index: 4, kind: input, shape index: {}]   ;;  %s1160_s5 = inlined_call_operand.hbm [shape: f32[32,32], index: 5, kind: input, shape index: {}]   ;;  %s1161_s6 = inlined_call_operand.hbm [shape: f32[1,32], index: 6, kind: input, shape index: {}]   ;;  %s1162_s7 = inlined_call_operand.hbm [shape: f32[32,32], index: 7, kind: input, shape index: {}]   ;;  %s1163_s8 = inlined_call_operand.hbm [shape: f32[1,32], index: 8, kind: input, shape index: {}]   ;;  %s1164_s9 = inlined_call_operand.hbm [shape: f32[16,32], index: 9, kind: output, shape index: {0}]   ;;  %s1165_s10 = inlined_call_operand.hbm [shape: f32[16,32], index: 10, kind: output, shape index: {1}]   ;;  %s1166_s11 = inlined_call_operand.hbm [shape: f32[16,32], index: 11, kind: output, shape index: {2}]  }
   0x1   :  { %18 = vsyncpa [#allocation6], 0 }
   0x2   :  { %19 = vsyncpa [#allocation9], 0 }
   0x3   :  { %20 = vsyncpa [#allocation12], 0 }
   0x4   :  { %21 = vsyncpa [#allocation15], 0 }
   0x5   :  { %22 = vsyncpa [#allocation4], 0 }
   0x6   :  { %23 = vsyncpa [#allocation19], 0  ;;  %s870_s17 = smov [#allocation5]   ;;  %s871_s19 = smov [#allocation8]  }
   0x7   :  { %s41_s18 = sshll.u32 %s870_s17, 4  ;;  %s65_s20 = sshll.u32 %s871_s19, 4  ;;  %s42_s18 = int_to_ptr.vmem [resolvable:$true] %s41_s18  ;;  %s944_s20 = int_to_ptr.vmem [resolvable:$true] %s65_s20 }
   0x8   :  { %s592_s23 = scalar_lea.hbm %s1156_s1, 256 }
   0x9   :  { %p593_p0 = scmp.ne.s32.totalorder %s1156_s1, %s592_s23  ;;  %p596_p1 = scmp.lt.u32.totalorder %s592_s23, %s1156_s1 }
   0xb   :  { %p598_p2 = pnand %p596_p1, %p593_p0 }
   0xd   :  { %601 = shalt.err (!%p598_p2)
}
   0xe   :  { %s602_s28 = scalar_lea.vmem %s42_s18, 256  ;;  %p607_p4 = scmp.lt.s32.totalorder %s42_s18, %s42_s18 }
   0xf   :  { %p603_p3 = scmp.ne.s32.totalorder %s42_s18, %s602_s28  ;;  %p608_p5 = scmp.lt.s32.totalorder %s602_s28, %s602_s28 }
  0x11   :  { %p609_p6 = por %p608_p5, %p607_p4 }
  0x13   :  { %p610_p7 = pnand %p609_p6, %p603_p3 }
  0x15   :  { %613 = shalt.err (!%p610_p7)
}
  0x16   :  { %s872_s29 = smov 128   ;;  %s873_s30 = smov 8  }
  0x17   :  { %47 = dma.hbm_to_vmem [thread:$0]  %s1156_s1, 256, %s42_s18, [#allocation6], %s872_s29, %s872_s29, %s873_s30  }
  0x18   :  { %s614_s16 = scalar_lea.hbm %s1158_s3, 512 }
  0x19   :  { %p615_p8 = scmp.ne.s32.totalorder %s1158_s3, %s614_s16  ;;  %p618_p9 = scmp.lt.u32.totalorder %s614_s16, %s1158_s3 }
  0x1b   :  { %p620_p10 = pnand %p618_p9, %p615_p8 }
  0x1d   :  { %623 = shalt.err (!%p620_p10)
}
  0x1e   :  { %s624_s23 = scalar_lea.vmem %s944_s20, 512  ;;  %p629_p12 = scmp.lt.s32.totalorder %s944_s20, %s944_s20 }
  0x1f   :  { %p625_p11 = scmp.ne.s32.totalorder %s944_s20, %s624_s23  ;;  %p630_p13 = scmp.lt.s32.totalorder %s624_s23, %s624_s23 }
  0x21   :  { %p631_p0 = por %p630_p13, %p629_p12 }
  0x23   :  { %p632_p1 = pnand %p631_p0, %p625_p11 }
  0x25   :  { %635 = shalt.err (!%p632_p1)
}
  0x26   :  { %71 = dma.hbm_to_vmem [thread:$0]  %s1158_s3, 512, %s944_s20, [#allocation9], %s872_s29, %s872_s29, %s873_s30  }
  0x27   :  { %s874_s24 = smov [#allocation11]   ;;  %s875_s26 = smov [#allocation14]  }
  0x28   :  { %s87_s25 = sshll.u32 %s874_s24, 4  ;;  %s109_s27 = sshll.u32 %s875_s26, 4  ;;  %s88_s25 = int_to_ptr.vmem [resolvable:$true] %s87_s25  ;;  %s981_s27 = int_to_ptr.vmem [resolvable:$true] %s109_s27 }
  0x29   :  { %s636_s13 = scalar_lea.hbm %s1160_s5, 512 }
  0x2a   :  { %p637_p2 = scmp.ne.s32.totalorder %s1160_s5, %s636_s13  ;;  %p640_p3 = scmp.lt.u32.totalorder %s636_s13, %s1160_s5 }
  0x2c   :  { %p642_p4 = pnand %p640_p3, %p637_p2 }
  0x2e   :  { %645 = shalt.err (!%p642_p4)
}
  0x2f   :  { %s646_s3 = scalar_lea.vmem %s88_s25, 512  ;;  %p651_p6 = scmp.lt.s32.totalorder %s88_s25, %s88_s25 }
  0x30   :  { %p647_p5 = scmp.ne.s32.totalorder %s88_s25, %s646_s3  ;;  %p652_p7 = scmp.lt.s32.totalorder %s646_s3, %s646_s3 }
  0x32   :  { %p653_p8 = por %p652_p7, %p651_p6 }
  0x34   :  { %p654_p9 = pnand %p653_p8, %p647_p5 }
  0x36   :  { %657 = shalt.err (!%p654_p9)
}
  0x37   :  { %93 = dma.hbm_to_vmem [thread:$0]  %s1160_s5, 512, %s88_s25, [#allocation12], %s872_s29, %s872_s29, %s873_s30  }
  0x38   :  { %s658_s23 = scalar_lea.hbm %s1162_s7, 512 }
  0x39   :  { %p659_p10 = scmp.ne.s32.totalorder %s1162_s7, %s658_s23  ;;  %p662_p11 = scmp.lt.u32.totalorder %s658_s23, %s1162_s7 }
  0x3b   :  { %p664_p12 = pnand %p662_p11, %p659_p10 }
  0x3d   :  { %667 = shalt.err (!%p664_p12)
}
  0x3e   :  { %s668_s28 = scalar_lea.vmem %s981_s27, 512  ;;  %p673_p0 = scmp.lt.s32.totalorder %s981_s27, %s981_s27 }
  0x3f   :  { %p669_p13 = scmp.ne.s32.totalorder %s981_s27, %s668_s28  ;;  %p674_p1 = scmp.lt.s32.totalorder %s668_s28, %s668_s28 }
  0x41   :  { %p675_p2 = por %p674_p1, %p673_p0 }
  0x43   :  { %p676_p3 = pnand %p675_p2, %p669_p13 }
  0x45   :  { %679 = shalt.err (!%p676_p3)
}
  0x46   :  { %115 = dma.hbm_to_vmem [thread:$0]  %s1162_s7, 512, %s981_s27, [#allocation15], %s872_s29, %s872_s29, %s873_s30  }
  0x47   :  { %s876_s12 = smov [#allocation2]   ;;  %s877_s14 = smov [#allocation7]  }
  0x48   :  { %s29_s13 = sshll.u32 %s876_s12, 4  ;;  %s53_s15 = sshll.u32 %s877_s14, 4  ;;  %s30_s13 = int_to_ptr.vmem [resolvable:$true] %s29_s13  ;;  %s1018_s15 = int_to_ptr.vmem [resolvable:$true] %s53_s15 }
  0x49   :  { %s680_s3 = scalar_lea.hbm %s1155_s0, 256 }
  0x4a   :  { %p681_p4 = scmp.ne.s32.totalorder %s1155_s0, %s680_s3  ;;  %p684_p5 = scmp.lt.u32.totalorder %s680_s3, %s1155_s0 }
  0x4c   :  { %p686_p6 = pnand %p684_p5, %p681_p4 }
  0x4e   :  { %689 = shalt.err (!%p686_p6)
}
  0x4f   :  { %s690_s7 = scalar_lea.vmem %s30_s13, 256  ;;  %p695_p8 = scmp.lt.s32.totalorder %s30_s13, %s30_s13 }
  0x50   :  { %p691_p7 = scmp.ne.s32.totalorder %s30_s13, %s690_s7  ;;  %p696_p9 = scmp.lt.s32.totalorder %s690_s7, %s690_s7 }
  0x52   :  { %p697_p10 = por %p696_p9, %p695_p8 }
  0x54   :  { %p698_p11 = pnand %p697_p10, %p691_p7 }
  0x56   :  { %701 = shalt.err (!%p698_p11)
}
  0x57   :  { %35 = dma.hbm_to_vmem [thread:$0]  %s1155_s0, 256, %s30_s13, [#allocation3], %s872_s29, %s872_s29, %s873_s30  }
  0x58   :  { %s702_s24 = scalar_lea.hbm %s1157_s2, 256 }
  0x59   :  { %p703_p12 = scmp.ne.s32.totalorder %s1157_s2, %s702_s24  ;;  %p706_p13 = scmp.lt.u32.totalorder %s702_s24, %s1157_s2 }
  0x5b   :  { %p708_p0 = pnand %p706_p13, %p703_p12 }
  0x5d   :  { %711 = shalt.err (!%p708_p0)
}
  0x5e   :  { %s712_s12 = scalar_lea.vmem %s1018_s15, 256  ;;  %p717_p2 = scmp.lt.s32.totalorder %s1018_s15, %s1018_s15 }
  0x5f   :  { %p713_p1 = scmp.ne.s32.totalorder %s1018_s15, %s712_s12  ;;  %p718_p3 = scmp.lt.s32.totalorder %s712_s12, %s712_s12 }
  0x61   :  { %p719_p4 = por %p718_p3, %p717_p2 }
  0x63   :  { %p720_p5 = pnand %p719_p4, %p713_p1 }
  0x65   :  { %723 = shalt.err (!%p720_p5)
}
  0x66   :  { %59 = dma.hbm_to_vmem [thread:$0]  %s1157_s2, 256, %s1018_s15, [#allocation6], %s872_s29, %s872_s29, %s873_s30  }
  0x67   :  { %s878_s14 = smov [#allocation10]   ;;  %s879_s17 = smov [#allocation13]  }
  0x68   :  { %s78_s16 = sshll.u32 %s878_s14, 4  ;;  %s100_s3 = sshll.u32 %s879_s17, 4  ;;  %s79_s16 = int_to_ptr.vmem [resolvable:$true] %s78_s16  ;;  %s101_s3 = int_to_ptr.vmem [resolvable:$true] %s100_s3 }
  0x69   :  { %s724_s21 = scalar_lea.hbm %s1159_s4, 16 }
  0x6a   :  { %p725_p6 = scmp.ne.s32.totalorder %s1159_s4, %s724_s21  ;;  %p728_p7 = scmp.lt.u32.totalorder %s724_s21, %s1159_s4 }
  0x6c   :  { %p730_p8 = pnand %p728_p7, %p725_p6 }
  0x6e   :  { %733 = shalt.err (!%p730_p8)
}
  0x6f   :  { %s734_s2 = scalar_lea.vmem %s79_s16, 16  ;;  %s738_s15 = scalar_lea.vmem %s79_s16, 32 }
  0x70   :  { %p735_p9 = scmp.ne.s32.totalorder %s79_s16, %s734_s2  ;;  %p739_p10 = scmp.lt.s32.totalorder %s79_s16, %s79_s16 }
  0x71   :  { %p740_p11 = scmp.lt.s32.totalorder %s738_s15, %s734_s2 }
  0x73   :  { %p741_p12 = por %p740_p11, %p739_p10 }
  0x75   :  { %p742_p13 = pnand %p741_p12, %p735_p9 }
  0x77   :  { %745 = shalt.err (!%p742_p13)
}
  0x78   :  { %81 = dma.hbm_to_vmem [thread:$0]  %s1159_s4, 16, %s79_s16, [#allocation9]  }
  0x79   :  { %s746_s28 = scalar_lea.hbm %s1161_s6, 16 }
  0x7a   :  { %p747_p0 = scmp.ne.s32.totalorder %s1161_s6, %s746_s28  ;;  %p750_p1 = scmp.lt.u32.totalorder %s746_s28, %s1161_s6 }
  0x7c   :  { %p752_p2 = pnand %p750_p1, %p747_p0 }
  0x7e   :  { %755 = shalt.err (!%p752_p2)
}
  0x7f   :  { %s756_s13 = scalar_lea.vmem %s101_s3, 16  ;;  %s760_s14 = scalar_lea.vmem %s101_s3, 32 }
  0x80   :  { %p757_p3 = scmp.ne.s32.totalorder %s101_s3, %s756_s13  ;;  %p761_p4 = scmp.lt.s32.totalorder %s101_s3, %s101_s3 }
  0x81   :  { %p762_p5 = scmp.lt.s32.totalorder %s760_s14, %s756_s13 }
  0x83   :  { %p763_p6 = por %p762_p5, %p761_p4 }
  0x85   :  { %p764_p7 = pnand %p763_p6, %p757_p3 }
  0x87   :  { %767 = shalt.err (!%p764_p7)
}
  0x88   :  { %103 = dma.hbm_to_vmem [thread:$0]  %s1161_s6, 16, %s101_s3, [#allocation12]  }
  0x89   :  { %s880_s17 = smov [#allocation16]   ;;  %s768_s22 = scalar_lea.hbm %s1163_s8, 16 }
  0x8a   :  { %s122_s20 = sshll.u32 %s880_s17, 4  ;;  %p769_p8 = scmp.ne.s32.totalorder %s1163_s8, %s768_s22  ;;  %s123_s20 = int_to_ptr.vmem [resolvable:$true] %s122_s20 }
  0x8b   :  { %p772_p9 = scmp.lt.u32.totalorder %s768_s22, %s1163_s8 }
  0x8d   :  { %p774_p10 = pnand %p772_p9, %p769_p8 }
  0x8f   :  { %777 = shalt.err (!%p774_p10)
}
  0x90   :  { %s778_s15 = scalar_lea.vmem %s123_s20, 16  ;;  %s782_s6 = scalar_lea.vmem %s123_s20, 32 }
  0x91   :  { %p779_p11 = scmp.ne.s32.totalorder %s123_s20, %s778_s15  ;;  %p783_p12 = scmp.lt.s32.totalorder %s123_s20, %s123_s20 }
  0x92   :  { %p784_p13 = scmp.lt.s32.totalorder %s782_s6, %s778_s15 }
  0x94   :  { %p785_p0 = por %p784_p13, %p783_p12 }
  0x96   :  { %p786_p1 = pnand %p785_p0, %p779_p11 }
  0x98   :  { %789 = shalt.err (!%p786_p1)
}
  0x99   :  { %125 = dma.hbm_to_vmem [thread:$0]  %s1163_s8, 16, %s123_s20, [#allocation15]  }
  0x9a   :  { %856 = dma.done.wait [#allocation3], 256  }
  0x9b   :  { %857 = vsyncadd [#allocation3], 4294967040 }
  0x9c   :  { %858 = dma.done.wait [#allocation6], 512  }
  0x9d   :  { %859 = vsyncadd [#allocation6], 4294966784 }
  0x9e   :  { %860 = dma.done.wait [#allocation9], 528  }
  0x9f   :  { %861 = vsyncadd [#allocation9], 4294966768 }
  0xa0   :  { %862 = dma.done.wait [#allocation12], 528  }
  0xa1   :  { %863 = vsyncadd [#allocation12], 4294966768 }
  0xa2   :  { %864 = dma.done.wait [#allocation15], 528  }
  0xa3   :  { %865 = vsyncadd [#allocation15], 4294966768  ;;  %v155_v0 = vld [vmem:[#allocation8] sm:$0xff]  ;;  %v156_v1 = vld [vmem:[#allocation8 + $0x8] sm:$0xff]  ;;  %vm166_vm0 = vcmask 261120   ;;  %s881_s8 = smov [#allocation17]  }
  0xa4   :  { %v157_v2 = vld [vmem:[#allocation8 + $0x10] sm:$0xff]  ;;  %v554_v3 = vpack.c.bf16 %v156_v1, %v155_v0  ;;  %v158_v4 = vld [vmem:[#allocation8 + $0x18] sm:$0xff]  ;;  %v252_v5 = vld [vmem:[#allocation11] sm:$0xff]  ;;  %s447_s18 = sshll.u32 %s881_s8, 4  ;;  %s882_s24 = smov [#allocation18]   ;;  %s448_s18 = int_to_ptr.vmem [resolvable:$true] %s447_s18 }
  0xa5   :  { %v253_v6 = vld [vmem:[#allocation11 + $0x8] sm:$0xff]  ;;  %v558_v7 = vpack.c.bf16 %v158_v4, %v157_v2  ;;  %v254_v12 = vld [vmem:[#allocation11 + $0x10] sm:$0xff]  ;;  %v255_v13 = vld [vmem:[#allocation11 + $0x18] sm:$0xff]  ;;  %s459_s26 = sshll.u32 %s882_s24, 4  ;;  %s790_s28 = scalar_lea.vmem %s448_s18, 256  ;;  %s1098_s26 = int_to_ptr.vmem [resolvable:$true] %s459_s26 }
  0xa6   :  { %v562_v8 = vpack.c.bf16 %v253_v6, %v252_v5  ;;  %v153_v9 = vld [vmem:[#allocation2] sm:$0xff]  ;;  %v348_v10 = vld [vmem:[#allocation14] sm:$0xff]  ;;  %555 = vmatprep.subr.bf16.mxu0 %v554_v3  ;;  %v566_v14 = vpack.c.bf16 %v255_v13, %v254_v12  ;;  %v351_v18 = vld [vmem:[#allocation14 + $0x18] sm:$0xff]  ;;  %p791_p2 = scmp.ne.s32.totalorder %s448_s18, %s790_s28  ;;  %p795_p3 = scmp.lt.s32.totalorder %s448_s18, %s448_s18 }
  0xa7   :  { %529 = vmatprep.mubr.msk.f32.mxu0 %vm166_vm0, %v153_v9  ;;  %v349_v11 = vld [vmem:[#allocation14 + $0x8] sm:$0xff]  ;;  %557 = vmatpush3.bf16.msra.mxu0 %v554_v3  ;;  %v250_v15 = vld [vmem:[#allocation5] sm:$0xff]  ;;  %v350_v17 = vld [vmem:[#allocation14 + $0x10] sm:$0xff]  ;;  %p796_p4 = scmp.lt.s32.totalorder %s790_s28, %s790_s28 }
  0xa8   :  { %563 = vmatprep.subr.bf16.mxu1 %v562_v8  ;;  %559 = vmatprep.subr.bf16.mxu0 %v558_v7  ;;  %v570_v16 = vpack.c.bf16 %v349_v11, %v348_v10  ;;  %v154_v19 = vld [vmem:[#allocation2 + $0x8] sm:$0xff]  ;;  %v574_v20 = vpack.c.bf16 %v351_v18, %v350_v17  ;;  %v251_v21 = vld [vmem:[#allocation5 + $0x8] sm:$0xff]  ;;  %v346_v22 = vld [vmem:[#allocation7] sm:$0xff] }
  0xa9   :  { %565 = vmatpush3.bf16.msra.mxu1 %v562_v8  ;;  %540 = vmatprep.mubr.msk.f32.mxu1 %vm166_vm0, %v250_v15  ;;  %v347_v23 = vld [vmem:[#allocation7 + $0x8] sm:$0xff]  ;;  %v494_v24 = vld [vmem:[#allocation10] ss:$0 sm:$0xff]  ;;  %v497_v25 = vld [vmem:[#allocation13] ss:$0 sm:$0xff]  ;;  %p797_p5 = por %p796_p4, %p795_p3 }
  0xaa   :  { %567 = vmatprep.subr.bf16.mxu1 %v566_v14 }
  0xab   :  { %561 = vmatpush3.bf16.msra.mxu0 %v558_v7  ;;  %p798_p6 = pnand %p797_p5, %p791_p2 }
  0xac   :  { %571 = vmatprep.subr.bf16.mxu0 %v570_v16 }
  0xad   :  { %569 = vmatpush3.bf16.msra.mxu1 %v566_v14 }
  0xae   :  { %530 = vmatmul.mubr.msk.f32.vlgmr.msra.gmra.mrb[0].mxu0 %vm166_vm0, %v154_v19 }
  0xaf   :  { %573 = vmatpush3.bf16.msra.mxu0 %v570_v16  ;;  %551 = vmatprep.mubr.msk.f32.mxu0 %vm166_vm0, %v346_v22 }
  0xb0   :  { %541 = vmatmul.mubr.msk.f32.vlgmr.msra.gmra.mrb[0].mxu1 %vm166_vm0, %v251_v21  ;;  %575 = vmatprep.subr.bf16.mxu0 %v574_v20 }
  0xb3   :  { %577 = vmatpush3.bf16.msra.mxu0 %v574_v20 }
  0xb6   :  { %552 = vmatmul.mubr.msk.f32.vlgmr.msra.gmra.mrb[2].mxu0 %vm166_vm0, %v347_v23 }
 0x181   :  { %v531_v26 = vpop.f32.mrb[0].mxu0 }
 0x182   :  { %v245_v27 = vadd.f32 %v531_v26, %v494_v24  ;;  %v239_v28 = vpop.f32.mrb[1].mxu0 }
 0x183   :  { %v542_v29 = vpop.f32.mrb[0].mxu1  ;;  %v240_v30 = vadd.f32 %v494_v24, %v239_v28 }
 0x184   :  { %v341_v31 = vadd.f32 %v542_v29, %v497_v25  ;;  %v335_v32 = vpop.f32.mrb[1].mxu1  ;;  %249 = vst.msk [vmem:[#allocation17 + $0x8] sm:$0xff] %vm166_vm0, %v245_v27 }
 0x185   :  { %v336_v33 = vadd.f32 %v497_v25, %v335_v32  ;;  %248 = vst.msk [vmem:[#allocation17] sm:$0xff] %vm166_vm0, %v240_v30 }
 0x186   :  { %345 = vst.msk [vmem:[#allocation18 + $0x8] sm:$0xff] %vm166_vm0, %v341_v31 }
 0x187   :  { %344 = vst.msk [vmem:[#allocation18] sm:$0xff] %vm166_vm0, %v336_v33 }
 0x188   :  { %801 = shalt.err (!%p798_p6)
}
 0x189   :  { %s802_s12 = scalar_lea.hbm %s1164_s9, 256 }
 0x18a   :  { %p803_p7 = scmp.ne.s32.totalorder %s1164_s9, %s802_s12  ;;  %p806_p8 = scmp.lt.u32.totalorder %s802_s12, %s1164_s9 }
 0x18c   :  { %p808_p9 = pnand %p806_p8, %p803_p7 }
 0x18e   :  { %811 = shalt.err (!%p808_p9)
}
 0x18f   :  { %453 = dma.vmem_to_hbm [thread:$0]  %s448_s18, 256, %s1164_s9, [#allocation4], %s872_s29, %s872_s29, %s873_s30   ;;  %v500_v34 = vld [vmem:[#allocation16] ss:$0 sm:$0xff] }
 0x190   :  { %s812_s20 = scalar_lea.vmem %s1098_s26, 256  ;;  %p817_p11 = scmp.lt.s32.totalorder %s1098_s26, %s1098_s26 }
 0x191   :  { %p813_p10 = scmp.ne.s32.totalorder %s1098_s26, %s812_s20  ;;  %p818_p12 = scmp.lt.s32.totalorder %s812_s20, %s812_s20 }
 0x193   :  { %p819_p13 = por %p818_p12, %p817_p11 }
 0x195   :  { %p820_p0 = pnand %p819_p13, %p813_p10 }
 0x197   :  { %823 = shalt.err (!%p820_p0)
}
 0x198   :  { %s824_s22 = scalar_lea.hbm %s1165_s10, 256 }
 0x199   :  { %p825_p1 = scmp.ne.s32.totalorder %s1165_s10, %s824_s22  ;;  %p828_p2 = scmp.lt.u32.totalorder %s824_s22, %s1165_s10 }
 0x19b   :  { %p830_p3 = pnand %p828_p2, %p825_p1 }
 0x19d   :  { %833 = shalt.err (!%p830_p3)
}
 0x19e   :  { %465 = dma.vmem_to_hbm [thread:$0]  %s1098_s26, 256, %s1165_s10, [#allocation19], %s872_s29, %s872_s29, %s873_s30   ;;  %v553_v35 = vpop.f32.mrb[2].mxu0 }
 0x19f   :  { %s883_s6 = smov [#allocation20]   ;;  %v437_v36 = vadd.f32 %v553_v35, %v500_v34  ;;  %v431_v37 = vpop.f32.mrb[3].mxu0 }
 0x1a0   :  { %s471_s3 = sshll.u32 %s883_s6, 4  ;;  %v432_v38 = vadd.f32 %v500_v34, %v431_v37  ;;  %s472_s3 = int_to_ptr.vmem [resolvable:$true] %s471_s3 }
 0x1a1   :  { %441 = vst.msk [vmem:[#allocation20 + $0x8] sm:$0xff] %vm166_vm0, %v437_v36  ;;  %s834_s1 = scalar_lea.vmem %s472_s3, 256  ;;  %p839_p5 = scmp.lt.s32.totalorder %s472_s3, %s472_s3 }
 0x1a2   :  { %440 = vst.msk [vmem:[#allocation20] sm:$0xff] %vm166_vm0, %v432_v38  ;;  %p835_p4 = scmp.ne.s32.totalorder %s472_s3, %s834_s1  ;;  %p840_p6 = scmp.lt.s32.totalorder %s834_s1, %s834_s1 }
 0x1a4   :  { %p841_p7 = por %p840_p6, %p839_p5 }
 0x1a6   :  { %p842_p8 = pnand %p841_p7, %p835_p4 }
 0x1a8   :  { %845 = shalt.err (!%p842_p8)
}
 0x1a9   :  { %s846_s18 = scalar_lea.hbm %s1166_s11, 256 }
 0x1aa   :  { %p847_p9 = scmp.ne.s32.totalorder %s1166_s11, %s846_s18  ;;  %p850_p10 = scmp.lt.u32.totalorder %s846_s18, %s1166_s11 }
 0x1ac   :  { %p852_p11 = pnand %p850_p10, %p847_p9 }
 0x1ae   :  { %855 = shalt.err (!%p852_p11)
}
 0x1af   :  { %477 = dma.vmem_to_hbm [thread:$0]  %s472_s3, 256, %s1166_s11, [#allocation19], %s872_s29, %s872_s29, %s873_s30  }
 0x1b0   :  { %866 = dma.done.wait [#allocation4], 256  }
 0x1b1   :  { %867 = vsyncadd [#allocation4], 4294967040 }
 0x1b2   :  { %868 = dma.done.wait [#allocation19], 512  }
 0x1b3   :  { %869 = vsyncadd [#allocation19], 4294966784 }
 0x1b4   :  { %487 = vsyncpa [#allocation3], 1 }
 0x1b5   :  { %488 = vsyncpa [#allocation6], 1 }
 0x1b6   :  { %489 = vsyncpa [#allocation9], 1 }
 0x1b7   :  { %490 = vsyncpa [#allocation12], 1 }
 0x1b8   :  { %491 = vsyncpa [#allocation15], 1 }
 0x1b9   :  { %492 = vsyncpa [#allocation4], 1 }
 0x1ba   :  { %493 = vsyncpa [#allocation19], 1 }

</bundles_post_ra>
